<compile_context>
chip_gen: v7x
topology: tpu7x:2x2x1
jax: 0.10.0
libtpu: 0.0.40
codegen_flags: <defaults>
</compile_context>

<pallas_src>
import functools

import jax
import jax.numpy as jnp
from jax import lax
from jax.experimental import pallas as pl
from jax.experimental.pallas import tpu as pltpu

HIDDEN = 512


def _round_up(v, m):
    return ((v + m - 1) // m) * m


def _mlp_kernel(x_ref, w1_ref, b1_ref, w2_ref, b2_ref, o_ref, acc_ref, *,
                d_in, tk, compute_dtype):
    """Fused MLP tile: accumulate x@W1 (+b1) over the K grid axis, then ReLU+W2+b2."""
    k = pl.program_id(1)
    nk = pl.num_programs(1)

    x_t = x_ref[...]
    w1_t = w1_ref[...]

    # Ragged last K tile: the grid over-covers d_in by < tk, and the OOB part of
    # a boundary input block is undefined, so zero both operands' tails before
    # the contraction. Only emitted when d_in % tk != 0 (static condition).
    if d_in % tk != 0:
        rem = d_in - k * tk                                  # >= tk except last step
        col = lax.broadcasted_iota(jnp.int32, x_t.shape, 1)
        x_t = jnp.where(col < rem, x_t, jnp.zeros_like(x_t))
        row = lax.broadcasted_iota(jnp.int32, w1_t.shape, 0)
        w1_t = jnp.where(row < rem, w1_t, jnp.zeros_like(w1_t))

    # Cast activations to the MXU dtype in-kernel (no wrapper copy of x).
    x_t = x_t.astype(compute_dtype)
    w1_t = w1_t.astype(compute_dtype)

    # First matmul (MXU), f32 accumulation across the input-feature (K) axis.
    part = jnp.dot(x_t, w1_t, preferred_element_type=jnp.float32)

    @pl.when(k == 0)
    def _():
        # Fold b1 into the accumulator init (saves zero-fill + epilogue add).
        acc_ref[...] = part + b1_ref[...].astype(jnp.float32)

    @pl.when(k > 0)
    def _():
        acc_ref[...] += part

    @pl.when(k == nk - 1)
    def _():
        # ReLU in f32 (cheap VPU path incl. v5e, which has no bf16 VALU); cast
        # to the MXU dtype only right before the second dot.
        h = jnp.maximum(acc_ref[...], 0.0)
        y = jnp.dot(h.astype(w2_ref.dtype), w2_ref[...],
                    preferred_element_type=jnp.float32)
        o_ref[...] = (y + b2_ref[...].astype(jnp.float32)).astype(o_ref.dtype)


@functools.partial(jax.jit, static_argnames=("block_b", "block_k"))
def omics_module_forward(x, w1, b1, w2, b2, *, block_b=1024, block_k=2048):
    """relu(x @ W1 + b1) @ W2 + b2 with W1:(d_in,512), W2:(512,d_out).

    bf16 weights select the bf16 MXU path; x tiles are cast to bf16 in-kernel
    (intentional approximation vs. a strict f32-activation reference) and
    accumulation stays f32.
    """
    B, d_in = x.shape
    hidden = w1.shape[1]
    d_out = w2.shape[1]
    out_dtype = x.dtype
    compute_dtype = w1.dtype

    # --- K (input-feature) tiling: multiples of 128 lanes, never a block that
    # lies fully past d_in; the ragged tail of the last tile is masked in-kernel,
    # so neither W1 nor x is ever padded / copied in the wrapper.
    if d_in <= 128:
        tk = d_in
    else:
        tk = min(_round_up(block_k, 128), (d_in // 128) * 128)

    # --- Batch tiling: large tiles so W1 is streamed from HBM as few times as
    # possible (the kernel is HBM-bound at small tiles). No forced split across
    # TensorCores: megacore only kicks in when B naturally spans >=2 tiles.
    if B < 8:
        bb = B                                    # full-dim block (legal when == dim)
    else:
        bb = min(_round_up(block_b, 8), (B // 8) * 8)

    x_isz = jnp.dtype(x.dtype).itemsize
    w1_isz = jnp.dtype(w1.dtype).itemsize
    w2_isz = jnp.dtype(w2.dtype).itemsize
    c_isz = jnp.dtype(compute_dtype).itemsize
    o_isz = jnp.dtype(out_dtype).itemsize

    def vmem_need(bb_, tk_):
        return (2 * bb_ * tk_ * x_isz             # x tiles (double buffered)
                + 2 * tk_ * hidden * w1_isz       # W1 K-tiles (double buffered)
                + bb_ * tk_ * c_isz               # in-kernel masked/cast x tile
                + tk_ * hidden * c_isz            # in-kernel masked W1 tile
                + hidden * d_out * w2_isz         # W2 (resident)
                + (hidden + d_out) * 4            # b1, b2 (resident)
                + 2 * bb_ * hidden * 4            # f32 acc scratch + partial product
                + bb_ * hidden * (4 + w2_isz)     # epilogue ReLU(h) + its cast
                + bb_ * d_out * 4                 # epilogue y (f32)
                + 2 * bb_ * d_out * o_isz)        # out tiles (double buffered)

    try:
        cap = int(getattr(pltpu.get_tpu_info(), "vmem_capacity_bytes", 0))
    except Exception:  # defensive: fall back to the smallest generation (v7x)
        cap = 0
    if cap <= 0:
        cap = 64 << 20
    budget = int(cap * 0.72)

    # Shrink tiles until the working set fits per-core VMEM; prefer keeping bb
    # large since it controls how often W1 is re-streamed from HBM.
    while vmem_need(bb, tk) > budget:
        if tk > 1024:
            tk = _round_up(tk // 2, 128)
        elif bb > 256:
            bb = _round_up(bb // 2, 8)
        elif tk > 256:
            tk = _round_up(tk // 2, 128)
        elif bb > 64:
            bb = _round_up(bb // 2, 8)
        else:
            break

    nb = pl.cdiv(B, bb)
    nk = pl.cdiv(d_in, tk)

    need = vmem_need(bb, tk)
    vmem_limit = max(32 << 20, need + (8 << 20))
    vmem_limit = int(min(vmem_limit, cap - (4 << 20)))

    cost = pl.CostEstimate(
        flops=2 * nb * bb * (nk * tk * hidden + hidden * d_out),
        transcendentals=0,
        bytes_accessed=(nb * bb * nk * tk * x_isz           # x streamed once
                        + nb * nk * tk * hidden * w1_isz    # W1 once per batch tile
                        + hidden * d_out * w2_isz
                        + (hidden + d_out) * 4
                        + B * d_out * o_isz),
    )

    kernel = functools.partial(_mlp_kernel, d_in=d_in, tk=tk,
                               compute_dtype=compute_dtype)

    b1r = jnp.asarray(b1).reshape(1, hidden)
    b2r = jnp.asarray(b2).reshape(1, d_out)

    return pl.pallas_call(
        kernel,
        out_shape=jax.ShapeDtypeStruct((B, d_out), out_dtype),
        grid_spec=pltpu.PrefetchScalarGridSpec(
            num_scalar_prefetch=0,
            grid=(nb, nk),
            in_specs=[
                pl.BlockSpec((bb, tk), lambda i, k: (i, k)),        # x tile
                pl.BlockSpec((tk, hidden), lambda i, k: (k, 0)),    # W1 K-tile
                pl.BlockSpec((1, hidden), lambda i, k: (0, 0),      # b1 (resident)
                             pipeline_mode=pl.Buffered(1)),
                pl.BlockSpec((hidden, d_out), lambda i, k: (0, 0),  # W2 (resident)
                             pipeline_mode=pl.Buffered(1)),
                pl.BlockSpec((1, d_out), lambda i, k: (0, 0),       # b2 (resident)
                             pipeline_mode=pl.Buffered(1)),
            ],
            out_specs=pl.BlockSpec((bb, d_out), lambda i, k: (i, 0)),
            scratch_shapes=[pltpu.VMEM((bb, hidden), jnp.float32)],
        ),
        compiler_params=pltpu.CompilerParams(
            dimension_semantics=("parallel", "arbitrary"),
            vmem_limit_bytes=vmem_limit,
        ),
        cost_estimate=cost,
    )(x, w1, b1r, w2, b2r)


def init_omics_params(key, input_dim, output_dim=128, hidden=HIDDEN,
                      dtype=jnp.float32):
    """Deterministic init mimicking nn.Linear default (uniform +/- 1/sqrt(fan_in)).

    Weights are returned in `dtype` (bf16 recommended for the MXU fast path);
    biases stay f32 since the kernel does bias/ReLU in f32 anyway.
    """
    k1, k2, k3, k4 = jax.random.split(key, 4)
    bound1 = 1.0 / (input_dim ** 0.5)
    bound2 = 1.0 / (hidden ** 0.5)
    w1 = jax.random.uniform(k1, (input_dim, hidden), jnp.float32,
                            -bound1, bound1).astype(dtype)
    b1 = jax.random.uniform(k2, (1, hidden), jnp.float32, -bound1, bound1)
    w2 = jax.random.uniform(k3, (hidden, output_dim), jnp.float32,
                            -bound2, bound2).astype(dtype)
    b2 = jax.random.uniform(k4, (1, output_dim), jnp.float32, -bound2, bound2)
    return w1, b1, w2, b2


def _reference(x, w1, b1, w2, b2):
    h = jnp.maximum(jnp.dot(x, w1, precision=lax.Precision.HIGHEST) + b1, 0.0)
    return jnp.dot(h, w2, precision=lax.Precision.HIGHEST) + b2


if __name__ == "__main__":
    key = jax.random.PRNGKey(0)
    k_x, k_x2, k_p, k_p2 = jax.random.split(key, 4)

    # Small shapes; input_dim intentionally not 128-aligned to exercise the
    # in-kernel ragged-K masking path.
    B, input_dim, output_dim = 16, 200, 128
    x = jax.random.normal(k_x, (B, input_dim), dtype=jnp.float32)

    # ---- f32 params: strict check of the fused kernel vs. pure-JAX reference.
    w1, b1, w2, b2 = init_omics_params(k_p, input_dim, output_dim,
                                       dtype=jnp.float32)
    out = jax.block_until_ready(omics_module_forward(x, w1, b1, w2, b2))
    ref = _reference(x, w1, b1, w2, b2)
    assert out.shape == (B, output_dim)
    assert jnp.allclose(out, ref, atol=1e-3, rtol=1e-3)

    # ---- Ragged batch (not a multiple of the batch tile) via boundary blocks.
    xr = jax.random.normal(k_x2, (10, input_dim), dtype=jnp.float32)
    out_r = jax.block_until_ready(omics_module_forward(xr, w1, b1, w2, b2))
    ref_r = _reference(xr, w1, b1, w2, b2)
    assert out_r.shape == (10, output_dim)
    assert jnp.allclose(out_r, ref_r, atol=1e-3, rtol=1e-3)

    # ---- 128-aligned input_dim (single K step, no masking code emitted).
    x2 = jax.random.normal(k_x, (B, 256), dtype=jnp.float32)
    w1a, b1a, w2a, b2a = init_omics_params(k_p2, 256, output_dim,
                                           dtype=jnp.float32)
    out_a = jax.block_until_ready(omics_module_forward(x2, w1a, b1a, w2a, b2a))
    ref_a = _reference(x2, w1a, b1a, w2a, b2a)
    assert jnp.allclose(out_a, ref_a, atol=1e-3, rtol=1e-3)

    # ---- bf16 weights (MXU-native): x cast to bf16 in-kernel, f32 accumulation.
    w1b, w2b = w1.astype(jnp.bfloat16), w2.astype(jnp.bfloat16)
    out_bf = jax.block_until_ready(omics_module_forward(x, w1b, b1, w2b, b2))
    xq = x.astype(jnp.bfloat16)
    hq = jnp.maximum(jnp.dot(xq, w1b, preferred_element_type=jnp.float32) + b1, 0.0)
    ref_bf = (jnp.dot(hq.astype(jnp.bfloat16), w2b,
                      preferred_element_type=jnp.float32) + b2)
    assert out_bf.shape == (B, output_dim)
    assert jnp.allclose(out_bf, ref_bf, atol=3e-2, rtol=3e-2)

    print("KERNEL_OK")
</pallas_src>

<mosaic_0001>
module attributes {stable_mosaic.version = 11 : i64} {
  func.func @_mlp_kernel(%arg0: i32, %arg1: i32, %arg2: memref<16x128xf32, #tpu.memory_space<vmem>>, %arg3: memref<128x512xf32, #tpu.memory_space<vmem>>, %arg4: memref<1x512xf32, #tpu.memory_space<vmem>>, %arg5: memref<512x128xf32, #tpu.memory_space<vmem>>, %arg6: memref<1x128xf32, #tpu.memory_space<vmem>>, %arg7: memref<16x128xf32, #tpu.memory_space<vmem>>, %arg8: memref<16x512xf32, #tpu.memory_space<vmem>>) attributes {dimension_semantics = [#tpu.dimension_semantics<parallel>, #tpu.dimension_semantics<arbitrary>], iteration_bounds = array<i64: 1, 2>, scalar_prefetch = 0 : i64, scratch_operands = 1 : i64, tpu.core_type = #tpu.core_type<tc>, window_params = [{transform_indices = @transform_0, window_bounds = array<i64: 16, 128>}, {transform_indices = @transform_1, window_bounds = array<i64: 128, 512>}, {pipeline_mode = #tpu.pipeline_mode<synchronous>, transform_indices = @transform_2, window_bounds = array<i64: 1, 512>}, {pipeline_mode = #tpu.pipeline_mode<synchronous>, transform_indices = @transform_3, window_bounds = array<i64: 512, 128>}, {pipeline_mode = #tpu.pipeline_mode<synchronous>, transform_indices = @transform_4, window_bounds = array<i64: 1, 128>}, {transform_indices = @transform_5, window_bounds = array<i64: 16, 128>}]} {
    %c0 = arith.constant 0 : index
    %c0_0 = arith.constant 0 : index
    %0 = vector.load %arg2[%c0, %c0_0] : memref<16x128xf32, #tpu.memory_space<vmem>>, vector<16x128xf32>
    %c0_1 = arith.constant 0 : index
    %c0_2 = arith.constant 0 : index
    %1 = vector.load %arg3[%c0_1, %c0_2] : memref<128x512xf32, #tpu.memory_space<vmem>>, vector<128x512xf32>
    %c128_i32 = arith.constant 128 : i32
    %2 = arith.muli %arg1, %c128_i32 : i32
    %c200_i32 = arith.constant 200 : i32
    %3 = arith.subi %c200_i32, %2 : i32
    %4 = tpu.iota {dimensions = array<i32: 1>} : vector<16x128xi32>
    %5 = vector.broadcast %3 : i32 to vector<16x128xi32>
    %6 = arith.cmpi slt, %4, %5 : vector<16x128xi32>
    %cst = arith.constant 0.000000e+00 : f32
    %7 = vector.broadcast %cst : f32 to vector<16x128xf32>
    %8 = arith.select %6, %0, %7 : vector<16x128xi1>, vector<16x128xf32>
    %9 = tpu.iota {dimensions = array<i32: 0>} : vector<128x512xi32>
    %10 = vector.broadcast %3 : i32 to vector<128x512xi32>
    %11 = arith.cmpi slt, %9, %10 : vector<128x512xi32>
    %cst_3 = arith.constant 0.000000e+00 : f32
    %12 = vector.broadcast %cst_3 : f32 to vector<128x512xf32>
    %13 = arith.select %11, %1, %12 : vector<128x512xi1>, vector<128x512xf32>
    %cst_4 = arith.constant dense<0.000000e+00> : vector<16x512xf32>
    %14 = tpu.matmul %8, %13, %cst_4 {dimension_numbers = #tpu.dot_dimension_numbers<[1], [0], [0], [1], [0, 0, 1, 1], [], []>} : vector<16x128xf32>, vector<128x512xf32>, vector<16x512xf32> -> vector<16x512xf32>
    %c0_i32 = arith.constant 0 : i32
    %15 = arith.cmpi eq, %arg1, %c0_i32 : i32
    %16 = arith.extui %15 : i1 to i32
    %c0_i32_5 = arith.constant 0 : i32
    %17 = arith.cmpi ne, %16, %c0_i32_5 : i32
    scf.if %17 {
      %c0_9 = arith.constant 0 : index
      %c0_10 = arith.constant 0 : index
      %24 = vector.load %arg4[%c0_9, %c0_10] : memref<1x512xf32, #tpu.memory_space<vmem>>, vector<1x512xf32>
      %25 = vector.broadcast %24 : vector<1x512xf32> to vector<16x512xf32>
      %26 = arith.addf %14, %25 : vector<16x512xf32>
      %c0_11 = arith.constant 0 : index
      %c0_12 = arith.constant 0 : index
      %27 = vector.load %arg8[%c0_11, %c0_12] : memref<16x512xf32, #tpu.memory_space<vmem>>, vector<16x512xf32>
      tpu.vector_store %arg8[%c0_11, %c0_12], %26 {strides = array<i32>} : memref<16x512xf32, #tpu.memory_space<vmem>>, vector<16x512xf32>,
    } else {
    }
    %c0_i32_6 = arith.constant 0 : i32
    %18 = arith.cmpi sgt, %arg1, %c0_i32_6 : i32
    %19 = arith.extui %18 : i1 to i32
    %c0_i32_7 = arith.constant 0 : i32
    %20 = arith.cmpi ne, %19, %c0_i32_7 : i32
    scf.if %20 {
      %c0_9 = arith.constant 0 : index
      %c0_10 = arith.constant 0 : index
      %24 = vector.load %arg8[%c0_9, %c0_10] : memref<16x512xf32, #tpu.memory_space<vmem>>, vector<16x512xf32>
      %25 = arith.addf %24, %14 : vector<16x512xf32>
      %c0_11 = arith.constant 0 : index
      %c0_12 = arith.constant 0 : index
      %26 = vector.load %arg8[%c0_11, %c0_12] : memref<16x512xf32, #tpu.memory_space<vmem>>, vector<16x512xf32>
      tpu.vector_store %arg8[%c0_11, %c0_12], %25 {strides = array<i32>} : memref<16x512xf32, #tpu.memory_space<vmem>>, vector<16x512xf32>,
    } else {
    }
    %c1_i32 = arith.constant 1 : i32
    %21 = arith.cmpi eq, %arg1, %c1_i32 : i32
    %22 = arith.extui %21 : i1 to i32
    %c0_i32_8 = arith.constant 0 : i32
    %23 = arith.cmpi ne, %22, %c0_i32_8 : i32
    scf.if %23 {
      %c0_9 = arith.constant 0 : index
      %c0_10 = arith.constant 0 : index
      %24 = vector.load %arg8[%c0_9, %c0_10] : memref<16x512xf32, #tpu.memory_space<vmem>>, vector<16x512xf32>
      %cst_11 = arith.constant 0.000000e+00 : f32
      %25 = vector.broadcast %cst_11 : f32 to vector<16x512xf32>
      %26 = arith.maximumf %24, %25 : vector<16x512xf32>
      %c0_12 = arith.constant 0 : index
      %c0_13 = arith.constant 0 : index
      %27 = vector.load %arg5[%c0_12, %c0_13] : memref<512x128xf32, #tpu.memory_space<vmem>>, vector<512x128xf32>
      %cst_14 = arith.constant dense<0.000000e+00> : vector<16x128xf32>
      %28 = tpu.matmul %26, %27, %cst_14 {dimension_numbers = #tpu.dot_dimension_numbers<[1], [0], [0], [1], [0, 0, 1, 1], [], []>} : vector<16x512xf32>, vector<512x128xf32>, vector<16x128xf32> -> vector<16x128xf32>
      %c0_15 = arith.constant 0 : index
      %c0_16 = arith.constant 0 : index
      %29 = vector.load %arg6[%c0_15, %c0_16] : memref<1x128xf32, #tpu.memory_space<vmem>>, vector<1x128xf32>
      %30 = vector.broadcast %29 : vector<1x128xf32> to vector<16x128xf32>
      %31 = arith.addf %28, %30 : vector<16x128xf32>
      %c0_17 = arith.constant 0 : index
      %c0_18 = arith.constant 0 : index
      %32 = vector.load %arg7[%c0_17, %c0_18] : memref<16x128xf32, #tpu.memory_space<vmem>>, vector<16x128xf32>
      tpu.vector_store %arg7[%c0_17, %c0_18], %31 {strides = array<i32>} : memref<16x128xf32, #tpu.memory_space<vmem>>, vector<16x128xf32>,
    } else {
    }
    return
  }
  func.func @transform_0(%arg0: i32, %arg1: i32) -> (i32, i32) {
    %c0_i32 = arith.constant 0 : i32
    return %arg0, %arg1 : i32, i32
  }
  func.func @transform_1(%arg0: i32, %arg1: i32) -> (i32, i32) {
    %c0_i32 = arith.constant 0 : i32
    %c0_i32_0 = arith.constant 0 : i32
    return %arg1, %c0_i32 : i32, i32
  }
  func.func @transform_2(%arg0: i32, %arg1: i32) -> (i32, i32) {
    %c0_i32 = arith.constant 0 : i32
    %c0_i32_0 = arith.constant 0 : i32
    %c0_i32_1 = arith.constant 0 : i32
    return %c0_i32, %c0_i32_0 : i32, i32
  }
  func.func @transform_3(%arg0: i32, %arg1: i32) -> (i32, i32) {
    %c0_i32 = arith.constant 0 : i32
    %c0_i32_0 = arith.constant 0 : i32
    %c0_i32_1 = arith.constant 0 : i32
    return %c0_i32, %c0_i32_0 : i32, i32
  }
  func.func @transform_4(%arg0: i32, %arg1: i32) -> (i32, i32) {
    %c0_i32 = arith.constant 0 : i32
    %c0_i32_0 = arith.constant 0 : i32
    %c0_i32_1 = arith.constant 0 : i32
    return %c0_i32, %c0_i32_0 : i32, i32
  }
  func.func @transform_5(%arg0: i32, %arg1: i32) -> (i32, i32) {
    %c0_i32 = arith.constant 0 : i32
    %c0_i32_0 = arith.constant 0 : i32
    return %arg0, %c0_i32 : i32, i32
  }
}

</mosaic_0001>

<bundles_post_ra>
// kernel: omics_module_forward.1
= control target key start
LH: loop header
LB: loop body
LE: loop exit
PB: predicated region body
PF: predicated region fallthrough
CT: control target
= control target key end

     0   :  { %10 = vsyncpa [#allocation4], 0  ;;  %s2154_s0 = inlined_call_operand.hbm [shape: f32[16,200], index: 0, kind: input, shape index: {}]   ;;  %s2155_s1 = inlined_call_operand.hbm [shape: f32[200,512], index: 1, kind: input, shape index: {}]   ;;  %s2156_s2 = inlined_call_operand.vmem [shape: f32[1,512], index: 2, kind: input, shape index: {}]   ;;  %s2157_s3 = inlined_call_operand.hbm [shape: f32[512,128], index: 3, kind: input, shape index: {}]   ;;  %s2158_s4 = inlined_call_operand.vmem [shape: f32[1,128], index: 4, kind: input, shape index: {}]   ;;  %s2159_s5 = inlined_call_operand.hbm [shape: f32[16,128], index: 5, kind: output, shape index: {}]  }
   0x1   :  { %12 = vsyncpa [#allocation4 + $0x1], 0 }
   0x2   :  { %13 = vsyncpa [#allocation7], 0 }
   0x3   :  { %15 = vsyncpa [#allocation7 + $0x1], 0 }
   0x4   :  { %16 = vsyncpa [#allocation5], 0  ;;  %s1699_s18 = smov 0   ;;  %s1701_s19 = smov 0  }
   0x5   :  { %s1703_s20 = smov 0   ;;  %s1705_s21 = smov 0  }
   0x6   :  { %s1707_s22 = smov 0   ;;  %s1709_s23 = smov 0  }
   0x7 LB: > { %s1728_s24 = sadd.s32 4294967295, %s1653_s23   ;;  %s31_s25 = sadd.s32 1, %s1649_s22  ;;  %s1653_s23 = sphi %s1709_s23, %s22_s23   ;;  %s1649_s22 = sphi %s1707_s22, %s2191_s22   ;;  %s1645_s21 = sphi %s1705_s21, %s2190_s21   ;;  %s1641_s20 = sphi %s1703_s20, %s2189_s20   ;;  %s1637_s19 = sphi %s1701_s19, %s2188_s19   ;;  %s1633_s18 = sphi %s1699_s18, %s2187_s18  }
   0x8   : > { %p32_p0 = scmp.ge.s32.totalorder %s31_s25, 2  ;;  %s43_s26 = sadd.s32 1, %s1641_s20 }
   0x9   : > { %p50_p1 = scmp.ne.s32.totalorder %s1641_s20, %s1637_s19  ;;  %p51_p2 = scmp.eq.s32.totalorder %s1653_s23, 0 }
   0xa   : > { %s2193_s25 = smov (%p32_p0, %s31_s25), 0  ;;  %p56_p4 = scmp.ne.s32.totalorder %s1637_s19, %s1633_s18 }
   0xb   : > { %p1737_p3 = por %p51_p2, %p50_p1  ;;  %s39_s28 = ssub.s32 %s1649_s22, %s2193_s25 }
   0xc   : > { %p2160_p5 = scmp.eq.s32.totalorder %s1728_s24, 0  ;;  %p41_p6 = scmp.eq.s32.totalorder %s39_s28, 0 }
   0xd   : > { %s2164_s27 = scalar_select %p1737_p3, 1, 0 }
   0xe   : > { %p1068_p7 = scmp.ge.s32.totalorder %s1653_s23, 1  ;;  %p1748_p8 = por %p2160_p5, %p56_p4 }
   0xf   : > { %p182_p9 = scmp.lt.s32.totalorder %s1653_s23, 3  ;;  %s1655_s7 = smov [#allocation8]  }
  0x10   : > { %s2165_s29 = scalar_select %p1748_p8, 1, 0 }
  0x11   : > { %s1754_s30 = scalar_select %p41_p6, %s1641_s20, %s43_s26  }
  0x12   : > { %p1756_p10 = pnand %p1068_p7, %p182_p9  ;;  %s197_s8 = sshll.u32 %s1655_s7, 4  ;;  %s198_s8 = int_to_ptr.vmem [resolvable:$true] %s197_s8 }
  0x13   : > { %s1481_s12 = scalar_lea.hbm %s2157_s3, 8192 }
  0x14   : > { %s2166_s6 = scalar_select %p1756_p10, 1, 0 }
  0x15   : > { %p1413_p11 = pneg %p1756_p10  ;;  %p1482_p13 = scmp.ne.s32.totalorder %s2157_s3, %s1481_s12 }
  0x16   : > { %p1488_p4 = scmp.lt.u32.totalorder %s1481_s12, %s2157_s3 }
  0x17   : > { %p1764_p12 = pnand %p1413_p11, %p2160_p5 }
  0x19   : > { %p1483_p0 = pneg %p1764_p12 }
  0x1b   : > { %p1484_p1 = pnand %p1483_p0, %p1482_p13 }
  0x1d   : > { %p1485_p2 = pneg %p1484_p1 }
  0x1f   : > { %p1490_p6 = pnand %p1488_p4, %p1485_p2 }
  0x21   : > { %1493 = shalt.err (!%p1490_p6)
}
  0x22   : > { %s1494_s17 = scalar_lea.vmem %s198_s8, 8192  ;;  %p1502_p5 = scmp.lt.s32.totalorder %s198_s8, %s198_s8 }
  0x23   : > { %p1495_p7 = scmp.ne.s32.totalorder %s198_s8, %s1494_s17  ;;  %p1503_p8 = scmp.lt.s32.totalorder %s1494_s17, %s1494_s17 }
  0x25   : > { %p1497_p9 = pnand %p1495_p7, %p1483_p0  ;;  %p1504_p10 = por %p1503_p8, %p1502_p5 }
  0x27   : > { %p1498_p11 = pneg %p1497_p9 }
  0x29   : > { %p1505_p3 = pnand %p1504_p10, %p1498_p11 }
  0x2b   : > { %1508 = shalt.err (!%p1505_p3)
}
  0x2c   : > { %s1656_s18 = smov 128   ;;  %s1657_s26 = smov 8  }
  0x2d   : > { %1416 = dma.hbm_to_vmem [thread:$0]  (!%p1764_p12), %s2157_s3, 8192, %s198_s8, [#allocation7], %s1656_s18, %s1656_s18, %s1657_s26  }
  0x2e   : > { %p1070_p13 = scmp.ge.s32.totalorder %s1653_s23, 2 }
  0x2f   : > { %s1786_s10 = sand.u32 (!%p1070_p13), 1, %s1641_s20   ;;  %s1072_s11 = sshll.u32 (!%p1070_p13), %s1649_s22, 7 }
  0x30   : > { %210 = sbr.rel (%p1070_p13) target bundleno = 108 (0x6c), region = 28  ;;  %s1071_s12 = sshll.u32 (!%p1070_p13), %s1786_s10, 4 }
  0x31   : > { %s1793_s9 = scalar_lea.hbm (!%p1070_p13), %s2154_s0, %s1072_s11  ;;  %s218_s8 = scalar_lea.vmem (!%p1070_p13), [#allocation3], %s1071_s12 }
  0x32   : > { %s227_s15 = sshll.u32 (!%p1070_p13), %s218_s8, 4  ;;  %s215_s16 = scalar_lea.sflag (!%p1070_p13), [#allocation4], %s1786_s10  ;;  %s1795_s15 = int_to_ptr.vmem [resolvable:$true] %s227_s15 }
  0x33   : > { %s1509_s17 = scalar_lea.hbm (!%p1070_p13), %s1793_s9, 256  ;;  %p2168_p5 = scmp.ne.s32.totalorder (!%p1070_p13), %s2164_s27, 0 }
  0x34   : > { %p1510_p3 = scmp.ne.s32.totalorder (!%p1070_p13), %s1793_s9, %s1509_s17  ;;  %s1513_s28 = scalar_lea.hbm (!%p1070_p13), %s2154_s0, 512 }
  0x35   : > { %p1514_p12 = scmp.lt.u32.totalorder (!%p1070_p13), %s1793_s9, %s2154_s0  ;;  %p1515_p0 = scmp.lt.u32.totalorder (!%p1070_p13), %s1513_s28, %s1509_s17 }
  0x36   : > { %p1511_p8 = pnand (!%p1070_p13), %p1510_p3, %p2168_p5  ;;  %p1517_p2 = scmp.lt.u32.totalorder (!%p1070_p13), %s1509_s17, %s1793_s9 }
  0x37   : > { %p1516_p1 = por %p1515_p0, %p1514_p12 }
  0x38   : > { %p1512_p10 = pneg %p1511_p8 }
  0x39   : > { %p1518_p4 = por %p1517_p2, %p1516_p1 }
  0x3b   : > { %p1519_p6 = pnand %p1518_p4, %p1512_p10 }
  0x3d   : > { %1522 = shalt.err (!%p1519_p6)
}
  0x3e   : > { %s1523_s12 = scalar_lea.vmem %s1795_s15, 256  ;;  %s1658_s13 = smov [#allocation3]  }
  0x3f   : > { %p1524_p7 = scmp.ne.s32.totalorder %s1795_s15, %s1523_s12  ;;  %s1527_s14 = sshll.u32 %s1658_s13, 4  ;;  %s1528_s14 = int_to_ptr.vmem [resolvable:$false] %s1527_s14 }
  0x40   : > { %s1529_s8 = scalar_lea.vmem %s1528_s14, 512  ;;  %p1530_p13 = scmp.lt.s32.totalorder %s1795_s15, %s1528_s14 }
  0x41   : > { %p1525_p9 = pnand %p1524_p7, %p2168_p5  ;;  %p1531_p3 = scmp.lt.s32.totalorder %s1529_s8, %s1523_s12 }
  0x43   : > { %p1526_p11 = pneg %p1525_p9  ;;  %p1532_p8 = por %p1531_p3, %p1530_p13 }
  0x45   : > { %p1533_p12 = pnand %p1532_p8, %p1526_p11 }
  0x47   : > { %1536 = shalt.err (!%p1533_p12)
}
  0x48   : > { %s1659_s17 = smov 256   ;;  %s1660_s18 = smov 128  }
  0x49   : > { %s1661_s26 = smov 8   ;;  %236 = sbr.rel (!%p2168_p5) target bundleno = 108 (0x6c), region = 36 }
  0x4a   : > { %1404 = dma.hbm_to_vmem [thread:$0]  (%p2168_p5), %s1793_s9, 256, %s1795_s15, %s215_s16, %s1659_s17, %s1660_s18, %s1661_s26  }
  0x4b   : > { %s237_s28 = sand.u32 (%p2168_p5), 1, %s1653_s23   ;;  %s1073_s7 = sshll.u32 (%p2168_p5), %s1786_s10, 9 }
  0x4c   : > { %s1074_s11 = sshll.u32 (%p2168_p5), %s1649_s22, 4  ;;  %s1829_s8 = scalar_lea.sflag (%p2168_p5), [#allocation7], %s237_s28 }
  0x4d   : > { %s243_s12 = ssub.s32 (%p2168_p5), 25, %s1074_s11  ;;  %s241_s9 = scalar_lea.vmem (%p2168_p5), [#allocation6], %s1073_s7 }
  0x4e   : > { %p244_p10 = scmp.lt.s32.totalorder (%p2168_p5), %s243_s12, 16 }
  0x50   : > { %s2195_s12 = smov (!%p244_p10, %s243_s12), 16 }
  0x51   : > { %s1826_s13 = sshll.u32 %s2195_s12, 9 }
  0x52   : > { %s249_s14 = ssub.s32 8192, %s1826_s13 }
  0x53   : > { %250 = vsyncadd %s1829_s8, %s249_s14  ;;  %p1077_p5 = scmp.ne.s32.totalorder %s1826_s13, 0  ;;  %s1165_s27 = sshll.u32 %s1649_s22, 13 }
  0x54   : > { %s1837_s16 = scalar_lea.hbm %s2155_s1, %s1165_s27  ;;  %s256_s17 = sshll.u32 %s241_s9, 4  ;;  %s1839_s17 = int_to_ptr.vmem [resolvable:$true] %s256_s17 }
  0x55   : > { %s1537_s18 = scalar_lea.hbm %s1837_s16, %s1826_s13  ;;  %s1541_s7 = scalar_lea.hbm %s2155_s1, 12800 }
  0x56   : > { %p1538_p0 = scmp.ne.s32.totalorder %s1837_s16, %s1537_s18  ;;  %p1542_p4 = scmp.lt.u32.totalorder %s1837_s16, %s2155_s1 }
  0x57   : > { %p1543_p6 = scmp.lt.u32.totalorder %s1541_s7, %s1537_s18  ;;  %p1545_p9 = scmp.lt.u32.totalorder %s1537_s18, %s1837_s16 }
  0x58   : > { %p1539_p1 = pnand %p1538_p0, %p1077_p5 }
  0x59   : > { %p1544_p7 = por %p1543_p6, %p1542_p4 }
  0x5a   : > { %p1540_p2 = pneg %p1539_p1 }
  0x5b   : > { %p1546_p11 = por %p1545_p9, %p1544_p7 }
  0x5d   : > { %p1547_p13 = pnand %p1546_p11, %p1540_p2 }
  0x5f   : > { %1550 = shalt.err (!%p1547_p13)
}
  0x60   : > { %s1551_s14 = scalar_lea.vmem %s1839_s17, %s1826_s13  ;;  %s1662_s9 = smov [#allocation6]  }
  0x61   : > { %p1552_p3 = scmp.ne.s32.totalorder %s1839_s17, %s1551_s14  ;;  %s1555_s27 = sshll.u32 %s1662_s9, 4  ;;  %s1556_s27 = int_to_ptr.vmem [resolvable:$false] %s1555_s27 }
  0x62   : > { %s1557_s10 = scalar_lea.vmem %s1556_s27, 16384  ;;  %p1558_p10 = scmp.lt.s32.totalorder %s1839_s17, %s1556_s27 }
  0x63   : > { %p1553_p8 = pnand %p1552_p3, %p1077_p5  ;;  %p1559_p0 = scmp.lt.s32.totalorder %s1557_s10, %s1551_s14 }
  0x65   : > { %p1554_p12 = pneg %p1553_p8  ;;  %p1560_p1 = por %p1559_p0, %p1558_p10 }
  0x67   : > { %p1561_p4 = pnand %p1560_p1, %p1554_p12 }
  0x69   : > { %1564 = shalt.err (!%p1561_p4)
}
  0x6a   : > { %s1663_s15 = smov 512   ;;  %s1664_s18 = smov 32  }
  0x6b   : > { %262 = dma.hbm_to_vmem [thread:$0]  (%p1077_p5), %s1837_s16, %s1826_s13, %s1839_s17, %s1829_s8, %s1663_s15, %s1663_s15, %s1664_s18  }
  0x6c PF: > { %p2169_p2 = scmp.ne.s32.totalorder %s2166_s6, 0 }
  0x6d   : > { %s270_s26 = sand.u32 (!%p2169_p2), 1, %s1637_s19   ;;  %p2170_p6 = scmp.ne.s32.totalorder (!%p2169_p2), %s2165_s29, 0 }
  0x6e   : > { %268 = sbr.rel (%p2169_p2) target bundleno = 681 (0x2a9), region = 40  ;;  %s1083_s28 = sshll.u32 (!%p2169_p2), %s270_s26, 4 }
  0x6f   : > { %s271_s7 = scalar_lea.sflag (!%p2169_p2), [#allocation4], %s270_s26  ;;  %s1869_s11 = scalar_lea.vmem (!%p2169_p2), [#allocation3], %s1083_s28 }
  0x75   : > { %1616 = dma.done.wait (%p2170_p6), %s271_s7, 256  }
  0x76   : > { %1618 = vsyncadd (%p2170_p6), %s271_s7, 4294967040  ;;  %s279_s13 = sand.u32 1, %s1728_s24   ;;  %s1084_s8 = sshll.u32 %s270_s26, 9 }
  0x77   : > { %s280_s16 = scalar_lea.sflag [#allocation7], %s279_s13  ;;  %s1876_s17 = scalar_lea.vmem [#allocation6], %s1084_s8 }
  0x78   : > { %1620 = dma.done.wait (%p2170_p6), %s280_s16, 8192  }
  0x79   : > { %1622 = vsyncadd (%p2170_p6), %s280_s16, 4294959104  ;;  %p2171_p5 = scmp.eq.s32.totalorder %s1728_s24, 0 }
  0x7b   : > { %1624 = dma.done.wait (%p2171_p5), [#allocation7], 8192   ;;  %p2172_p7 = pmov %p2171_p5 }
  0x7c   : > { %s1086_s6 = sshll.u32 %s1645_s21, 7  ;;  %v390_v0 = vlaneseq  ;;  %v1665_v1 = vmov 0.0   ;;  %v325_v9 = vld [vmem:[%s1876_s17 + $0x8] sm:$0xff]  ;;  %v327_v13 = vld [vmem:[%s1876_s17 + $0x18] sm:$0xff]  ;;  %v324_v15 = vld [vmem:[%s1876_s17] sm:$0xff]  ;;  %p1155_p9 = scmp.ne.s32.totalorder %s1645_s21, 0 }
  0x7d   : > { %1626 = vsyncadd (%p2172_p7), [#allocation7], 4294959104  ;;  %s389_s12 = ssub.s32 200, %s1086_s6  ;;  %557 = vmatprep.mubr.f32.mxu0 %v1665_v1  ;;  %634 = vmatprep.mubr.f32.mxu1 %v1665_v1  ;;  %v329_v10 = vld [vmem:[%s1876_s17 + $0x28] sm:$0xff]  ;;  %v331_v14 = vld [vmem:[%s1876_s17 + $0x38] sm:$0xff] }
  0x7e   : > { %v1889_v2 = vstv %s389_s12  ;;  %v1892_v3 = vshrl.u32 %v390_v0, 7  ;;  %v1242_v12 = vpack.c.bf16 %v329_v10, %v325_v9  ;;  %v1290_v16 = vpack.c.bf16 %v331_v14, %v327_v13  ;;  %v328_v17 = vld [vmem:[%s1876_s17 + $0x20] sm:$0xff]  ;;  %v326_v18 = vld [vmem:[%s1876_s17 + $0x10] sm:$0xff]  ;;  %v333_v24 = vld [vmem:[%s1876_s17 + $0x48] sm:$0xff] }
  0x7f   : > { %v330_v19 = vld [vmem:[%s1876_s17 + $0x30] sm:$0xff]  ;;  %v1245_v22 = vpack.c.bf16 %v328_v17, %v324_v15  ;;  %v337_v25 = vld [vmem:[%s1876_s17 + $0x68] sm:$0xff]  ;;  %v335_v28 = vld [vmem:[%s1876_s17 + $0x58] sm:$0xff] }
  0x80   : > { %v398_v4 = vadd.s32 8, %v1892_v3  ;;  %vm413_vm0 = vcmp.lt.s32.totalorder %v1892_v3, %v1889_v2  ;;  %v399_v5 = vadd.s32 16, %v1892_v3  ;;  %v400_v6 = vadd.s32 24, %v1892_v3  ;;  %v339_v29 = vld [vmem:[%s1876_s17 + $0x78] sm:$0xff]  ;;  %v332_v30 = vld [vmem:[%s1876_s17 + $0x40] sm:$0xff]  ;;  %v334_v33 = vld [vmem:[%s1876_s17 + $0x50] sm:$0xff] }
  0x81   : > { %v401_v7 = vadd.s32 32, %v1892_v3  ;;  %v402_v8 = vadd.s32 40, %v1892_v3  ;;  %v403_v20 = vadd.s32 48, %v1892_v3  ;;  %v404_v21 = vadd.s32 56, %v1892_v3  ;;  %v336_v32 = vld [vmem:[%s1876_s17 + $0x60] sm:$0xff]  ;;  %v338_v34 = vld [vmem:[%s1876_s17 + $0x70] sm:$0xff] }
  0x82   : > { %vm414_vm1 = vcmp.lt.s32.totalorder %v398_v4, %v1889_v2  ;;  %vm415_vm3 = vcmp.lt.s32.totalorder %v399_v5, %v1889_v2  ;;  %vm416_vm4 = vcmp.lt.s32.totalorder %v400_v6, %v1889_v2  ;;  %v1293_v23 = vpack.c.bf16 %v330_v19, %v326_v18  ;;  %v341_v37 = vld [vmem:[%s1876_s17 + $0x88] sm:$0xff]  ;;  %v343_v41 = vld [vmem:[%s1876_s17 + $0x98] sm:$0xff]  ;;  %v340_v43 = vld [vmem:[%s1876_s17 + $0x80] sm:$0xff] }
  0x83   : > { %vm1904_vm2 = vmpackc.low %vm414_vm1, %vm413_vm0  ;;  %vm417_vm6 = vcmp.lt.s32.totalorder %v401_v7, %v1889_v2  ;;  %vm418_vm7 = vcmp.lt.s32.totalorder %v402_v8, %v1889_v2  ;;  %v1248_v27 = vpack.c.bf16 %v337_v25, %v333_v24  ;;  %v1296_v31 = vpack.c.bf16 %v339_v29, %v335_v28  ;;  %v345_v38 = vld [vmem:[%s1876_s17 + $0xa8] sm:$0xff]  ;;  %v347_v42 = vld [vmem:[%s1876_s17 + $0xb8] sm:$0xff] }
  0x84   : > { %1244 = vmatprep.subr.msk.bf16.mxu0 %vm1904_vm2, %v1242_v12  ;;  %vm1926_vm5 = vmpackc.low %vm416_vm4, %vm415_vm3  ;;  %1292 = vmatprep.subr.msk.bf16.mxu1 %vm1904_vm2, %v1290_v16  ;;  %v1251_v35 = vpack.c.bf16 %v336_v32, %v332_v30  ;;  %v1299_v36 = vpack.c.bf16 %v338_v34, %v334_v33  ;;  %vm419_vm9 = vcmp.lt.s32.totalorder %v403_v20, %v1889_v2  ;;  %v344_v45 = vld [vmem:[%s1876_s17 + $0xa0] sm:$0xff]  ;;  %v342_v46 = vld [vmem:[%s1876_s17 + $0x90] sm:$0xff]  ;;  %v405_v48 = vadd.s32 64, %v1892_v3 }
  0x85   : > { %1247 = vmatpush1.bf16.msk.msra.mxu0 %vm1904_vm2, %v1245_v22  ;;  %1295 = vmatpush1.bf16.msk.msra.mxu1 %vm1904_vm2, %v1293_v23  ;;  %vm1952_vm8 = vmpackc.low %vm418_vm7, %vm417_vm6  ;;  %vm420_vm10 = vcmp.lt.s32.totalorder %v404_v21, %v1889_v2  ;;  %v1254_v40 = vpack.c.bf16 %v345_v38, %v341_v37  ;;  %v1302_v44 = vpack.c.bf16 %v347_v42, %v343_v41  ;;  %v346_v47 = vld [vmem:[%s1876_s17 + $0xb0] sm:$0xff]  ;;  %v406_v49 = vadd.s32 72, %v1892_v3  ;;  %v349_v52 = vld [vmem:[%s1876_s17 + $0xc8] sm:$0xff] }
  0x86   : > { %1250 = vmatprep.subr.msk.bf16.mxu0 %vm1926_vm5, %v1248_v27  ;;  %1298 = vmatprep.subr.msk.bf16.mxu1 %vm1926_vm5, %v1296_v31  ;;  %v1257_v50 = vpack.c.bf16 %v344_v45, %v340_v43  ;;  %v1305_v51 = vpack.c.bf16 %v346_v47, %v342_v46  ;;  %v353_v53 = vld [vmem:[%s1876_s17 + $0xe8] sm:$0xff]  ;;  %vm1978_vm11 = vmpackc.low %vm420_vm10, %vm419_vm9  ;;  %v407_v55 = vadd.s32 80, %v1892_v3  ;;  %v351_v57 = vld [vmem:[%s1876_s17 + $0xd8] sm:$0xff]  ;;  %v408_v60 = vadd.s32 88, %v1892_v3 }
  0x87   : > { %v1260_v56 = vpack.c.bf16 %v353_v53, %v349_v52  ;;  %v355_v58 = vld [vmem:[%s1876_s17 + $0xf8] sm:$0xff]  ;;  %v348_v59 = vld [vmem:[%s1876_s17 + $0xc0] sm:$0xff]  ;;  %v350_v63 = vld [vmem:[%s1876_s17 + $0xd0] sm:$0xff]  ;;  %vm421_vm12 = vcmp.lt.s32.totalorder %v405_v48, %v1889_v2  ;;  %vm422_vm13 = vcmp.lt.s32.totalorder %v406_v49, %v1889_v2  ;;  %v409_v12 = vadd.s32 96, %v1892_v3 }
  0x88   : > { %v1308_v61 = vpack.c.bf16 %v355_v58, %v351_v57  ;;  %v352_v62 = vld [vmem:[%s1876_s17 + $0xe0] sm:$0xff]  ;;  %v354_v4 = vld [vmem:[%s1876_s17 + $0xf0] sm:$0xff]  ;;  %v357_v5 = vld [vmem:[%s1876_s17 + $0x108] sm:$0xff]  ;;  %vm423_vm14 = vcmp.lt.s32.totalorder %v407_v55, %v1889_v2  ;;  %vm424_vm15 = vcmp.lt.s32.totalorder %v408_v60, %v1889_v2  ;;  %v410_v18 = vadd.s32 104, %v1892_v3 }
  0x89   : > { %1253 = vmatpush1.bf16.msk.msra.mxu0 %vm1926_vm5, %v1251_v35  ;;  %1301 = vmatpush1.bf16.msk.msra.mxu1 %vm1926_vm5, %v1299_v36  ;;  %v361_v6 = vld [vmem:[%s1876_s17 + $0x128] sm:$0xff]  ;;  %v1263_v7 = vpack.c.bf16 %v352_v62, %v348_v59  ;;  %v1311_v8 = vpack.c.bf16 %v354_v4, %v350_v63  ;;  %v359_v9 = vld [vmem:[%s1876_s17 + $0x118] sm:$0xff]  ;;  %v356_v11 = vld [vmem:[%s1876_s17 + $0x100] sm:$0xff]  ;;  %vm425_vm2 = vcmp.lt.s32.totalorder %v409_v12, %v1889_v2  ;;  %v411_v37 = vadd.s32 112, %v1892_v3 }
  0x8a   : > { %1256 = vmatprep.subr.msk.bf16.mxu0 %vm1952_vm8, %v1254_v40  ;;  %1304 = vmatprep.subr.msk.bf16.mxu1 %vm1952_vm8, %v1302_v44  ;;  %v363_v10 = vld [vmem:[%s1876_s17 + $0x138] sm:$0xff]  ;;  %v1266_v13 = vpack.c.bf16 %v361_v6, %v357_v5  ;;  %v360_v15 = vld [vmem:[%s1876_s17 + $0x120] sm:$0xff]  ;;  %v358_v16 = vld [vmem:[%s1876_s17 + $0x110] sm:$0xff]  ;;  %vm426_vm3 = vcmp.lt.s32.totalorder %v410_v18, %v1889_v2  ;;  %v412_v38 = vadd.s32 120, %v1892_v3  ;;  %v391_v62 = vand.u32 127, %v390_v0 }
  0x8b   : > { %v1314_v14 = vpack.c.bf16 %v363_v10, %v359_v9  ;;  %v362_v17 = vld [vmem:[%s1876_s17 + $0x130] sm:$0xff]  ;;  %vm2020_vm0 = vmpackc.low %vm422_vm13, %vm421_vm12  ;;  %v365_v20 = vld [vmem:[%s1876_s17 + $0x148] sm:$0xff]  ;;  %v1269_v24 = vpack.c.bf16 %v360_v15, %v356_v11  ;;  %vm427_vm5 = vcmp.lt.s32.totalorder %v411_v37, %v1889_v2  ;;  %v659_v12 = vsub.s32 (!%p1155_p9), 1, %v1892_v3 }
  0x8c   : > { %v369_v21 = vld [vmem:[%s1876_s17 + $0x168] sm:$0xff]  ;;  %v367_v22 = vld [vmem:[%s1876_s17 + $0x158] sm:$0xff]  ;;  %v1317_v25 = vpack.c.bf16 %v362_v17, %v358_v16  ;;  %vm2034_vm1 = vmpackc.low %vm424_vm15, %vm423_vm14  ;;  %vm428_vm6 = vcmp.lt.s32.totalorder %v412_v38, %v1889_v2 }
  0x8d   : > { %1259 = vmatpush1.bf16.msk.msra.mxu0 %vm1952_vm8, %v1257_v50  ;;  %1307 = vmatpush1.bf16.msk.msra.mxu1 %vm1952_vm8, %v1305_v51  ;;  %v371_v23 = vld [vmem:[%s1876_s17 + $0x178] sm:$0xff]  ;;  %v364_v27 = vld [vmem:[%s1876_s17 + $0x140] sm:$0xff]  ;;  %v1272_v29 = vpack.c.bf16 %v369_v21, %v365_v20  ;;  %v366_v31 = vld [vmem:[%s1876_s17 + $0x150] sm:$0xff]  ;;  %vm393_vm8 = vcmp.lt.s32.totalorder %v391_v62, %v1889_v2 }
  0x8e   : > { %1262 = vmatprep.subr.msk.bf16.mxu0 %vm1978_vm11, %v1260_v56  ;;  %1310 = vmatprep.subr.msk.bf16.mxu1 %vm1978_vm11, %v1308_v61  ;;  %v368_v28 = vld [vmem:[%s1876_s17 + $0x160] sm:$0xff]  ;;  %v1320_v30 = vpack.c.bf16 %v371_v23, %v367_v22  ;;  %v370_v32 = vld [vmem:[%s1876_s17 + $0x170] sm:$0xff]  ;;  %v373_v33 = vld [vmem:[%s1876_s17 + $0x188] sm:$0xff] }
  0x8f   : > { %v377_v34 = vld [vmem:[%s1876_s17 + $0x1a8] sm:$0xff]  ;;  %v375_v35 = vld [vmem:[%s1876_s17 + $0x198] sm:$0xff]  ;;  %v1275_v39 = vpack.c.bf16 %v368_v28, %v364_v27  ;;  %v1323_v40 = vpack.c.bf16 %v370_v32, %v366_v31  ;;  %vm2060_vm4 = vmpackc.low %vm426_vm3, %vm425_vm2 }
  0x90   : > { %v379_v36 = vld [vmem:[%s1876_s17 + $0x1b8] sm:$0xff]  ;;  %v372_v42 = vld [vmem:[%s1876_s17 + $0x180] sm:$0xff]  ;;  %v1278_v44 = vpack.c.bf16 %v377_v34, %v373_v33  ;;  %v374_v46 = vld [vmem:[%s1876_s17 + $0x190] sm:$0xff] }
  0x91   : > { %1265 = vmatpush1.bf16.msk.msra.mxu0 %vm1978_vm11, %v1263_v7  ;;  %1313 = vmatpush1.bf16.msk.msra.mxu1 %vm1978_vm11, %v1311_v8  ;;  %v376_v43 = vld [vmem:[%s1876_s17 + $0x1a0] sm:$0xff]  ;;  %v1326_v45 = vpack.c.bf16 %v379_v36, %v375_v35  ;;  %v378_v47 = vld [vmem:[%s1876_s17 + $0x1b0] sm:$0xff]  ;;  %v381_v48 = vld [vmem:[%s1876_s17 + $0x1c8] sm:$0xff] }
  0x92   : > { %1268 = vmatprep.subr.msk.bf16.mxu0 %vm2020_vm0, %v1266_v13  ;;  %1316 = vmatprep.subr.msk.bf16.mxu1 %vm2020_vm0, %v1314_v14  ;;  %v385_v49 = vld [vmem:[%s1876_s17 + $0x1e8] sm:$0xff]  ;;  %v383_v50 = vld [vmem:[%s1876_s17 + $0x1d8] sm:$0xff]  ;;  %v1281_v52 = vpack.c.bf16 %v376_v43, %v372_v42  ;;  %v1329_v53 = vpack.c.bf16 %v378_v47, %v374_v46  ;;  %v380_v54 = vld [vmem:[%s1876_s17 + $0x1c0] sm:$0xff]  ;;  %v663_v13 = vsub.s32 (!%p1155_p9), 2, %v1892_v3  ;;  %v667_v14 = vsub.s32 (!%p1155_p9), 3, %v1892_v3 }
  0x93   : > { %v387_v51 = vld [vmem:[%s1876_s17 + $0x1f8] sm:$0xff]  ;;  %v1284_v55 = vpack.c.bf16 %v385_v49, %v381_v48  ;;  %v384_v57 = vld [vmem:[%s1876_s17 + $0x1e0] sm:$0xff]  ;;  %v382_v58 = vld [vmem:[%s1876_s17 + $0x1d0] sm:$0xff] }
  0x94   : > { %v1332_v56 = vpack.c.bf16 %v387_v51, %v383_v50  ;;  %v386_v59 = vld [vmem:[%s1876_s17 + $0x1f0] sm:$0xff]  ;;  %vm1285_vm7 = vmpackc.low %vm428_vm6, %vm427_vm5  ;;  %v1287_v60 = vpack.c.bf16 %v384_v57, %v380_v54  ;;  %v323_v4 = vld [vmem:[%s1869_s11 + $0x8] sm:$0xff] }
  0x95   : > { %1271 = vmatpush1.bf16.msk.msra.mxu0 %vm2020_vm0, %v1269_v24  ;;  %1319 = vmatpush1.bf16.msk.msra.mxu1 %vm2020_vm0, %v1317_v25  ;;  %v1335_v61 = vpack.c.bf16 %v386_v59, %v382_v58  ;;  %v322_v63 = vld [vmem:[%s1869_s11] sm:$0xff] }
  0x96   : > { %1274 = vmatprep.subr.msk.bf16.mxu0 %vm2034_vm1, %v1272_v29  ;;  %1322 = vmatprep.subr.msk.bf16.mxu1 %vm2034_vm1, %v1320_v30  ;;  %v651_v2 = vld [vmem:[%s2156_s2] sm:$0xf] (!%p1155_p9) }
  0x97   : > { %v660_v16 = vrot.slane (!%p1155_p9), %v651_v2, %v659_v12  ;;  %v664_v17 = vrot.slane (!%p1155_p9), %v651_v2, %v663_v13  ;;  %v668_v18 = vrot.slane (!%p1155_p9), %v651_v2, %v667_v14 }
  0x99   : > { %1277 = vmatpush1.bf16.msk.msra.mxu0 %vm2034_vm1, %v1275_v39  ;;  %1325 = vmatpush1.bf16.msk.msra.mxu1 %vm2034_vm1, %v1323_v40 }
  0x9a   : > { %1280 = vmatprep.subr.msk.bf16.mxu0 %vm2060_vm4, %v1278_v44  ;;  %1328 = vmatprep.subr.msk.bf16.mxu1 %vm2060_vm4, %v1326_v45 }
  0x9d   : > { %1283 = vmatpush1.bf16.msk.msra.mxu0 %vm2060_vm4, %v1281_v52  ;;  %1331 = vmatpush1.bf16.msk.msra.mxu1 %vm2060_vm4, %v1329_v53 }
  0x9e   : > { %1286 = vmatprep.subr.msk.bf16.mxu0 %vm1285_vm7, %v1284_v55  ;;  %1334 = vmatprep.subr.msk.bf16.mxu1 %vm1285_vm7, %v1332_v56 }
  0xa1   : > { %1289 = vmatpush1.bf16.msk.msra.mxu0 %vm1285_vm7, %v1287_v60  ;;  %1337 = vmatpush1.bf16.msk.msra.mxu1 %vm1285_vm7, %v1335_v61 }
  0xa4   : > { %1119 = vmatmul.mubr.msk.f32.vlgmr.msra.gmra.mrb[0].mxu0 %vm393_vm8, %v322_v63  ;;  %1153 = vmatmul.mubr.msk.f32.vlgmr.msra.gmra.mrb[0].mxu1 %vm393_vm8, %v322_v63 }
  0xa5   : > { %563 = vmatprep.mubr.f32.mxu0 %v1665_v1  ;;  %640 = vmatprep.mubr.f32.mxu1 %v1665_v1  ;;  %v655_v1 = vsub.s32 (!%p1155_p9), 0, %v1892_v3 }
  0xa7   : > { %v656_v15 = vrot.slane (!%p1155_p9), %v651_v2, %v655_v1 }
  0xa8   : > { %1120 = vmatmul.mubr.msk.f32.gmra.mrb[2].mxu0 %vm393_vm8, %v323_v4  ;;  %1154 = vmatmul.mubr.msk.f32.gmra.mrb[2].mxu1 %vm393_vm8, %v323_v4 }
 0x176   : > { %650 = sbr.rel (%p1155_p9) target bundleno = 384 (0x180), region = 56 }
 0x177   : > { %v559_v5 = vpop.f32.mrb[0].mxu0  ;;  %v636_v6 = vpop.f32.mrb[0].mxu1 }
 0x178   : > { %v561_v7 = vpop.f32.mrb[1].mxu0  ;;  %v638_v0 = vpop.f32.mrb[1].mxu1  ;;  %v673_v19 = vadd.f32 (!%p1155_p9), %v656_v15, %v559_v5  ;;  %v675_v21 = vadd.f32 (!%p1155_p9), %v664_v17, %v636_v6 }
 0x179   : > { %v674_v20 = vadd.f32 (!%p1155_p9), %v660_v16, %v561_v7  ;;  %v676_v22 = vadd.f32 (!%p1155_p9), %v668_v18, %v638_v0 }
 0x17a   : > { %681 = vst [vmem:[#allocation2] sm:$0xff] (!%p1155_p9), %v673_v19  ;;  %683 = vst [vmem:[#allocation2 + $0x10] sm:$0xff] (!%p1155_p9), %v675_v21 }
 0x17b   : > { %v565_v8 = vpop.f32.mrb[2].mxu0  ;;  %v642_v9 = vpop.f32.mrb[2].mxu1  ;;  %682 = vst [vmem:[#allocation2 + $0x8] sm:$0xff] (!%p1155_p9), %v674_v20  ;;  %684 = vst [vmem:[#allocation2 + $0x18] sm:$0xff] (!%p1155_p9), %v676_v22 }
 0x17c   : > { %v567_v10 = vpop.f32.mrb[3].mxu0  ;;  %v644_v11 = vpop.f32.mrb[3].mxu1  ;;  %v677_v23 = vadd.f32 (!%p1155_p9), %v656_v15, %v565_v8  ;;  %v679_v25 = vadd.f32 (!%p1155_p9), %v664_v17, %v642_v9 }
 0x17d   : > { %v678_v24 = vadd.f32 %v660_v16, %v567_v10  ;;  %v680_v26 = vadd.f32 %v668_v18, %v644_v11 }
 0x17e   : > { %685 = vst [vmem:[#allocation2 + $0x20] sm:$0xff] %v677_v23  ;;  %687 = vst [vmem:[#allocation2 + $0x30] sm:$0xff] %v679_v25 }
 0x17f   : > { %686 = vst [vmem:[#allocation2 + $0x28] sm:$0xff] %v678_v24  ;;  %688 = vst [vmem:[#allocation2 + $0x38] sm:$0xff] %v680_v26 }
 0x180 PF: > { %p1156_p11 = scmp.le.s32.totalorder %s1645_s21, 0 }
 0x182   : > { %692 = sbr.rel (%p1156_p11) target bundleno = 395 (0x18b), region = 60 }
 0x184   : > { %v693_v3 = vld [vmem:[#allocation2] sm:$0xff] (!%p1156_p11)  ;;  %v695_v28 = vld [vmem:[#allocation2 + $0x10] sm:$0xff] (!%p1156_p11) }
 0x185   : > { %v694_v27 = vld [vmem:[#allocation2 + $0x8] sm:$0xff] (!%p1156_p11)  ;;  %v701_v29 = vadd.f32 (!%p1156_p11), %v693_v3, %v559_v5  ;;  %v703_v31 = vadd.f32 (!%p1156_p11), %v695_v28, %v636_v6  ;;  %v696_v32 = vld [vmem:[#allocation2 + $0x18] sm:$0xff] (!%p1156_p11)  ;;  %v697_v33 = vld [vmem:[#allocation2 + $0x20] sm:$0xff] (!%p1156_p11) }
 0x186   : > { %v702_v30 = vadd.f32 (!%p1156_p11), %v694_v27, %v561_v7  ;;  %v698_v34 = vld [vmem:[#allocation2 + $0x28] sm:$0xff] (!%p1156_p11)  ;;  %v704_v35 = vadd.f32 (!%p1156_p11), %v696_v32, %v638_v0  ;;  %v705_v36 = vadd.f32 (!%p1156_p11), %v697_v33, %v565_v8  ;;  %v699_v38 = vld [vmem:[#allocation2 + $0x30] sm:$0xff] (!%p1156_p11)  ;;  %v700_v39 = vld [vmem:[#allocation2 + $0x38] sm:$0xff] (!%p1156_p11) }
 0x187   : > { %v706_v37 = vadd.f32 (!%p1156_p11), %v698_v34, %v567_v10  ;;  %709 = vst [vmem:[#allocation2] sm:$0xff] (!%p1156_p11), %v701_v29  ;;  %711 = vst [vmem:[#allocation2 + $0x10] sm:$0xff] (!%p1156_p11), %v703_v31  ;;  %v707_v40 = vadd.f32 (!%p1156_p11), %v699_v38, %v642_v9  ;;  %v708_v41 = vadd.f32 (!%p1156_p11), %v700_v39, %v644_v11 }
 0x188   : > { %710 = vst [vmem:[#allocation2 + $0x8] sm:$0xff] (!%p1156_p11), %v702_v30  ;;  %712 = vst [vmem:[#allocation2 + $0x18] sm:$0xff] (!%p1156_p11), %v704_v35 }
 0x189   : > { %713 = vst [vmem:[#allocation2 + $0x20] sm:$0xff] %v705_v36  ;;  %714 = vst [vmem:[#allocation2 + $0x28] sm:$0xff] %v706_v37 }
 0x18a   : > { %715 = vst [vmem:[#allocation2 + $0x30] sm:$0xff] %v707_v40  ;;  %716 = vst [vmem:[#allocation2 + $0x38] sm:$0xff] %v708_v41 }
 0x18b PF: > { %p1157_p13 = scmp.ne.s32.totalorder %s1645_s21, 1 }
 0x18c   : > { %v753_v42 = vld [vmem:[#allocation8 + $0x80] sm:$0xff] (!%p1157_p13)  ;;  %v754_v43 = vld [vmem:[#allocation8 + $0x88] sm:$0xff] (!%p1157_p13)  ;;  %v755_v53 = vld [vmem:[#allocation8 + $0x90] sm:$0xff] (!%p1157_p13) }
 0x18d   : > { %720 = sbr.rel (%p1157_p13) target bundleno = 655 (0x28f), region = 64  ;;  %v737_v44 = vld [vmem:[#allocation8] sm:$0xff] (!%p1157_p13)  ;;  %v1338_v45 = vpack.c.bf16 (!%p1157_p13), %v754_v43, %v753_v42  ;;  %v738_v46 = vld [vmem:[#allocation8 + $0x8] sm:$0xff] (!%p1157_p13)  ;;  %v756_v55 = vld [vmem:[#allocation8 + $0x98] sm:$0xff] (!%p1157_p13) }
 0x18e   : > { %v785_v47 = vld [vmem:[#allocation8 + $0x180] sm:$0xff] (!%p1157_p13)  ;;  %v786_v48 = vld [vmem:[#allocation8 + $0x188] sm:$0xff] (!%p1157_p13)  ;;  %v1340_v49 = vpack.c.bf16 (!%p1157_p13), %v738_v46, %v737_v44  ;;  %v739_v56 = vld [vmem:[#allocation8 + $0x10] sm:$0xff] (!%p1157_p13)  ;;  %v1342_v58 = vpack.c.bf16 (!%p1157_p13), %v756_v55, %v755_v53 }
 0x18f   : > { %v1370_v50 = vpack.c.bf16 (!%p1157_p13), %v786_v48, %v785_v47  ;;  %v769_v51 = vld [vmem:[#allocation8 + $0x100] sm:$0xff] (!%p1157_p13)  ;;  %v770_v52 = vld [vmem:[#allocation8 + $0x108] sm:$0xff] (!%p1157_p13)  ;;  %1339 = vmatprep.subr.bf16.mxu0 (!%p1157_p13), %v1338_v45  ;;  %v740_v57 = vld [vmem:[#allocation8 + $0x18] sm:$0xff] (!%p1157_p13) }
 0x190   : > { %v1372_v54 = vpack.c.bf16 (!%p1157_p13), %v770_v52, %v769_v51  ;;  %1341 = vmatpush3.bf16.msra.mxu0 (!%p1157_p13), %v1340_v49  ;;  %v1344_v59 = vpack.c.bf16 (!%p1157_p13), %v740_v57, %v739_v56  ;;  %v787_v60 = vld [vmem:[#allocation8 + $0x190] sm:$0xff] (!%p1157_p13)  ;;  %v788_v61 = vld [vmem:[#allocation8 + $0x198] sm:$0xff] (!%p1157_p13)  ;;  %v757_v5 = vld [vmem:[#allocation8 + $0xa0] sm:$0xff] (!%p1157_p13) }
 0x191   : > { %1371 = vmatprep.subr.bf16.mxu1 (!%p1157_p13), %v1370_v50  ;;  %v771_v62 = vld [vmem:[#allocation8 + $0x110] sm:$0xff] (!%p1157_p13)  ;;  %v1374_v63 = vpack.c.bf16 (!%p1157_p13), %v788_v61, %v787_v60  ;;  %v772_v4 = vld [vmem:[#allocation8 + $0x118] sm:$0xff] (!%p1157_p13)  ;;  %v758_v6 = vld [vmem:[#allocation8 + $0xa8] sm:$0xff] (!%p1157_p13)  ;;  %1343 = vmatprep.subr.bf16.mxu0 (!%p1157_p13), %v1342_v58 }
 0x192   : > { %1373 = vmatpush3.bf16.msra.mxu1 (!%p1157_p13), %v1372_v54  ;;  %v1376_v7 = vpack.c.bf16 (!%p1157_p13), %v772_v4, %v771_v62  ;;  %v1346_v0 = vpack.c.bf16 (!%p1157_p13), %v758_v6, %v757_v5  ;;  %v741_v8 = vld [vmem:[#allocation8 + $0x20] sm:$0xff] (!%p1157_p13)  ;;  %v742_v9 = vld [vmem:[#allocation8 + $0x28] sm:$0xff] (!%p1157_p13)  ;;  %v759_v14 = vld [vmem:[#allocation8 + $0xb0] sm:$0xff] (!%p1157_p13) }
 0x193   : > { %v789_v10 = vld [vmem:[#allocation8 + $0x1a0] sm:$0xff] (!%p1157_p13)  ;;  %1375 = vmatprep.subr.bf16.mxu1 (!%p1157_p13), %v1374_v63  ;;  %v790_v11 = vld [vmem:[#allocation8 + $0x1a8] sm:$0xff] (!%p1157_p13)  ;;  %v1348_v12 = vpack.c.bf16 (!%p1157_p13), %v742_v9, %v741_v8  ;;  %v760_v15 = vld [vmem:[#allocation8 + $0xb8] sm:$0xff] (!%p1157_p13) }
 0x194   : > { %v773_v2 = vld [vmem:[#allocation8 + $0x120] sm:$0xff]  ;;  %v774_v1 = vld [vmem:[#allocation8 + $0x128] sm:$0xff]  ;;  %1345 = vmatpush3.bf16.msra.mxu0 %v1344_v59  ;;  %v1378_v13 = vpack.c.bf16 %v790_v11, %v789_v10  ;;  %v743_v16 = vld [vmem:[#allocation8 + $0x30] sm:$0xff]  ;;  %v1350_v18 = vpack.c.bf16 %v760_v15, %v759_v14 }
 0x195   : > { %1347 = vmatprep.subr.bf16.mxu0 %v1346_v0  ;;  %v1380_v17 = vpack.c.bf16 %v774_v1, %v773_v2  ;;  %v744_v19 = vld [vmem:[#allocation8 + $0x38] sm:$0xff]  ;;  %v791_v20 = vld [vmem:[#allocation8 + $0x1b0] sm:$0xff]  ;;  %v761_v25 = vld [vmem:[#allocation8 + $0xc0] sm:$0xff] }
 0x196   : > { %1377 = vmatpush3.bf16.msra.mxu1 %v1376_v7  ;;  %v792_v21 = vld [vmem:[#allocation8 + $0x1b8] sm:$0xff]  ;;  %v775_v23 = vld [vmem:[#allocation8 + $0x130] sm:$0xff]  ;;  %v762_v26 = vld [vmem:[#allocation8 + $0xc8] sm:$0xff]  ;;  %v1352_v3 = vpack.c.bf16 %v744_v19, %v743_v16 }
 0x197   : > { %1379 = vmatprep.subr.bf16.mxu1 %v1378_v13  ;;  %v1382_v22 = vpack.c.bf16 %v792_v21, %v791_v20  ;;  %v776_v24 = vld [vmem:[#allocation8 + $0x138] sm:$0xff]  ;;  %v793_v27 = vld [vmem:[#allocation8 + $0x1c0] sm:$0xff]  ;;  %v794_v28 = vld [vmem:[#allocation8 + $0x1c8] sm:$0xff]  ;;  %v1354_v30 = vpack.c.bf16 %v762_v26, %v761_v25 }
 0x198   : > { %1349 = vmatpush3.bf16.msra.mxu0 %v1348_v12  ;;  %v1384_v29 = vpack.c.bf16 %v776_v24, %v775_v23  ;;  %v745_v31 = vld [vmem:[#allocation8 + $0x40] sm:$0xff]  ;;  %v746_v32 = vld [vmem:[#allocation8 + $0x48] sm:$0xff]  ;;  %v1386_v34 = vpack.c.bf16 %v794_v28, %v793_v27  ;;  %v763_v36 = vld [vmem:[#allocation8 + $0xd0] sm:$0xff] }
 0x199   : > { %1351 = vmatprep.subr.bf16.mxu0 %v1350_v18  ;;  %v777_v33 = vld [vmem:[#allocation8 + $0x140] sm:$0xff]  ;;  %v778_v35 = vld [vmem:[#allocation8 + $0x148] sm:$0xff]  ;;  %v764_v37 = vld [vmem:[#allocation8 + $0xd8] sm:$0xff]  ;;  %v1356_v40 = vpack.c.bf16 %v746_v32, %v745_v31 }
 0x19a   : > { %1381 = vmatpush3.bf16.msra.mxu1 %v1380_v17  ;;  %v795_v38 = vld [vmem:[#allocation8 + $0x1d0] sm:$0xff]  ;;  %v796_v39 = vld [vmem:[#allocation8 + $0x1d8] sm:$0xff]  ;;  %v1388_v41 = vpack.c.bf16 %v778_v35, %v777_v33  ;;  %v1358_v42 = vpack.c.bf16 %v764_v37, %v763_v36  ;;  %v765_v48 = vld [vmem:[#allocation8 + $0xe0] sm:$0xff] }
 0x19b   : > { %1383 = vmatprep.subr.bf16.mxu1 %v1382_v22  ;;  %v747_v43 = vld [vmem:[#allocation8 + $0x50] sm:$0xff]  ;;  %v748_v44 = vld [vmem:[#allocation8 + $0x58] sm:$0xff]  ;;  %v1390_v46 = vpack.c.bf16 %v796_v39, %v795_v38  ;;  %v766_v49 = vld [vmem:[#allocation8 + $0xe8] sm:$0xff] }
 0x19c   : > { %1353 = vmatpush3.bf16.msra.mxu0 %v1352_v3  ;;  %v779_v45 = vld [vmem:[#allocation8 + $0x150] sm:$0xff]  ;;  %v780_v47 = vld [vmem:[#allocation8 + $0x158] sm:$0xff]  ;;  %v797_v50 = vld [vmem:[#allocation8 + $0x1e0] sm:$0xff]  ;;  %v1360_v52 = vpack.c.bf16 %v748_v44, %v747_v43  ;;  %v1362_v56 = vpack.c.bf16 %v766_v49, %v765_v48 }
 0x19d   : > { %1355 = vmatprep.subr.bf16.mxu0 %v1354_v30  ;;  %v798_v51 = vld [vmem:[#allocation8 + $0x1e8] sm:$0xff]  ;;  %v749_v53 = vld [vmem:[#allocation8 + $0x60] sm:$0xff]  ;;  %v1392_v55 = vpack.c.bf16 %v780_v47, %v779_v45  ;;  %v767_v61 = vld [vmem:[#allocation8 + $0xf0] sm:$0xff] }
 0x19e   : > { %1385 = vmatpush3.bf16.msra.mxu1 %v1384_v29  ;;  %v750_v54 = vld [vmem:[#allocation8 + $0x68] sm:$0xff]  ;;  %v781_v57 = vld [vmem:[#allocation8 + $0x160] sm:$0xff]  ;;  %v1394_v60 = vpack.c.bf16 %v798_v51, %v797_v50  ;;  %v768_v62 = vld [vmem:[#allocation8 + $0xf8] sm:$0xff] }
 0x19f   : > { %1387 = vmatprep.subr.bf16.mxu1 %v1386_v34  ;;  %v782_v58 = vld [vmem:[#allocation8 + $0x168] sm:$0xff]  ;;  %v724_v4 = vld [vmem:[#allocation2 + $0x18] sm:$0xff]  ;;  %v799_v5 = vld [vmem:[#allocation8 + $0x1f0] sm:$0xff]  ;;  %v1364_v0 = vpack.c.bf16 %v750_v54, %v749_v53  ;;  %v1366_v9 = vpack.c.bf16 %v768_v62, %v767_v61 }
 0x1a0   : > { %1357 = vmatpush3.bf16.msra.mxu0 %v1356_v40  ;;  %v722_v59 = vld [vmem:[#allocation2 + $0x8] sm:$0xff]  ;;  %v800_v6 = vld [vmem:[#allocation8 + $0x1f8] sm:$0xff]  ;;  %v732_v7 = vmax.f32 %v724_v4, 0.0  ;;  %v1396_v8 = vpack.c.bf16 %v782_v58, %v781_v57  ;;  %v751_v10 = vld [vmem:[#allocation8 + $0x70] sm:$0xff] }
 0x1a1   : > { %1359 = vmatprep.subr.bf16.mxu0 %v1358_v42  ;;  %v730_v63 = vmax.f32 %v722_v59, 0.0  ;;  %v752_v11 = vld [vmem:[#allocation8 + $0x78] sm:$0xff]  ;;  %v1398_v2 = vpack.c.bf16 %v800_v6, %v799_v5  ;;  %v783_v1 = vld [vmem:[#allocation8 + $0x170] sm:$0xff]  ;;  %v721_v14 = vld [vmem:[#allocation2] sm:$0xff] }
 0x1a2   : > { %1389 = vmatpush3.bf16.msra.mxu1 %v1388_v41  ;;  %v784_v12 = vld [vmem:[#allocation8 + $0x178] sm:$0xff]  ;;  %947 = vmatprep.mubr.f32.mxu1 %v732_v7  ;;  %v1368_v13 = vpack.c.bf16 %v752_v11, %v751_v10  ;;  %v723_v16 = vld [vmem:[#allocation2 + $0x10] sm:$0xff]  ;;  %v726_v17 = vld [vmem:[#allocation2 + $0x28] sm:$0xff]  ;;  %v729_v19 = vmax.f32 %v721_v14, 0.0 }
 0x1a3   : > { %1391 = vmatprep.subr.bf16.mxu1 %v1390_v46  ;;  %872 = vmatprep.mubr.f32.mxu0 %v730_v63  ;;  %v1400_v15 = vpack.c.bf16 %v784_v12, %v783_v1  ;;  %v728_v18 = vld [vmem:[#allocation2 + $0x38] sm:$0xff]  ;;  %v731_v20 = vmax.f32 %v723_v16, 0.0  ;;  %v734_v21 = vmax.f32 %v726_v17, 0.0  ;;  %v725_v22 = vld [vmem:[#allocation2 + $0x20] sm:$0xff]  ;;  %v727_v24 = vld [vmem:[#allocation2 + $0x30] sm:$0xff] }
 0x1a4   : > { %1361 = vmatpush3.bf16.msra.mxu0 %v1360_v52  ;;  %v736_v23 = vmax.f32 %v728_v18, 0.0  ;;  %v733_v25 = vmax.f32 %v725_v22, 0.0  ;;  %v735_v26 = vmax.f32 %v727_v24, 0.0  ;;  %v1158_v27 = vld [vmem:[%s2158_s4] ss:$0 sm:$0xff] }
 0x1a5   : > { %1363 = vmatprep.subr.bf16.mxu0 %v1362_v56 }
 0x1a6   : > { %1393 = vmatpush3.bf16.msra.mxu1 %v1392_v55 }
 0x1a7   : > { %1395 = vmatprep.subr.bf16.mxu1 %v1394_v60 }
 0x1a8   : > { %1365 = vmatpush3.bf16.msra.mxu0 %v1364_v0 }
 0x1a9   : > { %1367 = vmatprep.subr.bf16.mxu0 %v1366_v9 }
 0x1aa   : > { %1397 = vmatpush3.bf16.msra.mxu1 %v1396_v8 }
 0x1ab   : > { %1399 = vmatprep.subr.bf16.mxu1 %v1398_v2 }
 0x1ac   : > { %1369 = vmatpush3.bf16.msra.mxu0 %v1368_v13 }
 0x1ae   : > { %1401 = vmatpush3.bf16.msra.mxu1 %v1400_v15 }
 0x1af   : > { %873 = vmatmul.mubr.f32.vlgmr.msra.gmra.mrb[0].mxu0 %v729_v19 }
 0x1b0   : > { %877 = vmatprep.mubr.f32.mxu0 %v734_v21 }
 0x1b1   : > { %948 = vmatmul.mubr.f32.vlgmr.msra.gmra.mrb[0].mxu1 %v731_v20 }
 0x1b2   : > { %952 = vmatprep.mubr.f32.mxu1 %v736_v23 }
 0x1b3   : > { %878 = vmatmul.mubr.f32.gmra.mrb[2].mxu0 %v733_v25 }
 0x1b5   : > { %953 = vmatmul.mubr.f32.gmra.mrb[2].mxu1 %v735_v26 }
 0x282   : > { %v1198_v3 = vpop.f32.mrb[0].mxu0 }
 0x283   : > { %v1199_v28 = vpop.f32.mrb[1].mxu0 }
 0x284   : > { %v1236_v29 = vpop.f32.mrb[0].mxu1  ;;  %v1200_v30 = vadd.f32 %v1199_v28, %v1198_v3 }
 0x285   : > { %v1237_v31 = vpop.f32.mrb[1].mxu1 }
 0x286   : > { %v1238_v32 = vadd.f32 %v1237_v31, %v1236_v29  ;;  %v875_v33 = vadd.f32 %v1200_v30, %v1158_v27  ;;  %v1201_v34 = vpop.f32.mrb[2].mxu0 }
 0x287   : > { %v1202_v35 = vpop.f32.mrb[3].mxu0 }
 0x288   : > { %v1239_v36 = vpop.f32.mrb[2].mxu1  ;;  %v950_v37 = vadd.f32 %v1238_v32, %v875_v33  ;;  %v1203_v38 = vadd.f32 %v1202_v35, %v1201_v34 }
 0x289   : > { %v1240_v39 = vpop.f32.mrb[3].mxu1 }
 0x28a   : > { %v1241_v40 = vadd.f32 %v1240_v39, %v1239_v36  ;;  %958 = vst [vmem:[#allocation9] sm:$0xff] %v950_v37  ;;  %v880_v41 = vadd.f32 %v1203_v38, %v1158_v27 }
 0x28c   : > { %v955_v42 = vadd.f32 %v1241_v40, %v880_v41 }
 0x28e   : > { %959 = vst [vmem:[#allocation9 + $0x8] sm:$0xff] %v955_v42 }
 0x28f PF: > { %p1419_p3 = scmp.eq.s32.totalorder %s1728_s24, 1  ;;  %s1666_s27 = smov [#allocation9]  }
 0x290   : > { %s969_s10 = sshll.u32 %s1666_s27, 4  ;;  %s970_s10 = int_to_ptr.vmem [resolvable:$true] %s969_s10 }
 0x291   : > { %s1565_s15 = scalar_lea.vmem %s970_s10, 256  ;;  %p1572_p0 = scmp.lt.s32.totalorder %s970_s10, %s970_s10 }
 0x292   : > { %p1566_p8 = scmp.ne.s32.totalorder %s970_s10, %s1565_s15  ;;  %p1573_p1 = scmp.lt.s32.totalorder %s1565_s15, %s1565_s15 }
 0x294   : > { %p1567_p12 = pnand %p1566_p8, %p1419_p3  ;;  %p1574_p4 = por %p1573_p1, %p1572_p0 }
 0x296   : > { %p1568_p10 = pneg %p1567_p12 }
 0x298   : > { %p1575_p2 = pnand %p1574_p4, %p1568_p10 }
 0x29a   : > { %1578 = shalt.err (!%p1575_p2)
}
 0x29b   : > { %s1579_s28 = scalar_lea.hbm %s2159_s5, 256 }
 0x29c   : > { %p1580_p6 = scmp.ne.s32.totalorder %s2159_s5, %s1579_s28  ;;  %p1585_p9 = scmp.lt.u32.totalorder %s1579_s28, %s2159_s5 }
 0x29e   : > { %p1581_p5 = pnand %p1580_p6, %p1419_p3 }
 0x2a0   : > { %p1582_p7 = pneg %p1581_p5 }
 0x2a2   : > { %p1587_p11 = pnand %p1585_p9, %p1582_p7 }
 0x2a4   : > { %1590 = shalt.err (!%p1587_p11)
}
 0x2a5   : > { %s1667_s16 = smov 128   ;;  %s1668_s17 = smov 8  }
 0x2a6   : > { %1410 = dma.vmem_to_hbm [thread:$0]  (%p1419_p3), %s970_s10, 256, %s2159_s5, [#allocation5], %s1667_s16, %s1667_s16, %s1668_s17  }
 0x2a7   : > { %1628 = dma.done.wait (%p1419_p3), [#allocation5], 256  }
 0x2a8   : > { %1630 = vsyncadd (%p1419_p3), [#allocation5], 4294967040 }
 0x2a9 PF: > { %s22_s23 = sadd.s32 1, %s1653_s23   ;;  %s2187_s18 = smov %s1637_s19 }
 0x2aa   : > { %p19_p13 = scmp.ge.s32.totalorder %s22_s23, 4   ;;  %s2188_s19 = smov %s1641_s20 }
 0x2ab   : > { %s2189_s20 = smov %s1754_s30  ;;  %s2190_s21 = smov %s1649_s22 }
 0x2ac   : > { %s2191_s22 = smov %s2193_s25  ;;  %21 = sbr.rel (!%p19_p13) target bundleno = 7 (0x7), region = 107 }
 0x2b3   :  { %985 = vsyncpa [#allocation4], 1 }
 0x2b4   :  { %987 = vsyncpa [#allocation4 + $0x1], 1 }
 0x2b5   :  { %988 = vsyncpa [#allocation7], 1 }
 0x2b6   :  { %990 = vsyncpa [#allocation7 + $0x1], 1 }
 0x2b7   :  { %991 = vsyncpa [#allocation5], 1 }
 0x2b8   :  { %993 = vsyncpa [#allocation5 + $0x1], 1 }

</bundles_post_ra>
